<compile_context>
chip_gen: v7x
topology: tpu7x:2x2x1
jax: 0.10.0
libtpu: 0.0.40
codegen_flags: <defaults>
</compile_context>

<pallas_src>
import functools

import jax
import jax.numpy as jnp
from jax import lax
from jax.experimental import pallas as pl
from jax.experimental.pallas import tpu as pltpu


def _round_up(v, m):
    return (v + m - 1) // m * m


def _vmem_footprint(BB, TC, Hp):
    pre_b = TC * BB * 4 * Hp * 2        # bf16 pre-activations (double buffered)
    out_b = TC * BB * Hp * 4            # f32 hidden sequence  (double buffered)
    state = BB * Hp * 4                 # h_n / c_n (f32)
    whh_b = Hp * 4 * Hp * 2             # bf16 recurrent weight
    return 2 * (pre_b + out_b) + 4 * state + 2 * whh_b


def _choose_tiles(B, T, Hp, budget=24 << 20):
    BB = min(_round_up(B, 8), 256)
    TC = min(T, 32)
    while _vmem_footprint(BB, TC, Hp) > budget and TC > 8:
        TC = max(TC // 2, 8)
    while _vmem_footprint(BB, TC, Hp) > budget and BB > 8:
        BB = max(BB // 2, 8)
    while _vmem_footprint(BB, TC, Hp) > budget and TC > 1:
        TC = max(TC // 2, 1)
    return BB, TC


def _lstm_recurrent_kernel(pre_ref, whh_ref, out_ref, hn_ref, cn_ref, *,
                           T, TC, Hp):
    """Time-chunked LSTM recurrence.

    pre_ref : (TC, BB, 4*Hp) bf16  precomputed x@Wih^T + bias (gate-blocked, padded)
    whh_ref : (Hp, 4*Hp)     bf16  hidden->gates weight (gate-blocked, padded)
    out_ref : (TC, BB, Hp)   f32   hidden sequence for this chunk (time-major)
    hn_ref  : (BB, Hp)       f32   final hidden state (resident carry across chunks)
    cn_ref  : (BB, Hp)       f32   final cell state   (resident carry across chunks)
    """
    c_idx = pl.program_id(1)

    @pl.when(c_idx == 0)
    def _():
        hn_ref[...] = jnp.zeros_like(hn_ref)
        cn_ref[...] = jnp.zeros_like(cn_ref)

    t0 = c_idx * TC   # absolute index of the first timestep in this chunk

    def step(t, carry):
        h, c = carry                                             # f32 (BB, Hp)
        pre_t = pre_ref[t].astype(jnp.float32)                   # (BB, 4*Hp)
        gates = pre_t + jnp.dot(h.astype(jnp.bfloat16), whh_ref[...],
                                preferred_element_type=jnp.float32)
        # Lane-aligned gate slices (Hp multiple of 128). PyTorch order i,f,g,o.
        i_g = jax.nn.sigmoid(gates[:, 0 * Hp:1 * Hp])
        f_g = jax.nn.sigmoid(gates[:, 1 * Hp:2 * Hp])
        g_g = jnp.tanh(gates[:, 2 * Hp:3 * Hp])
        o_g = jax.nn.sigmoid(gates[:, 3 * Hp:4 * Hp])
        c_new = f_g * c + i_g * g_g
        h_new = o_g * jnp.tanh(c_new)
        out_ref[t] = h_new.astype(out_ref.dtype)   # full (BB, Hp) lane-dense store
        # Mask the carry update for padded tail timesteps (static trip count).
        valid = (t0 + t) < T
        return jnp.where(valid, h_new, h), jnp.where(valid, c_new, c)

    h_f, c_f = lax.fori_loop(0, TC, step, (hn_ref[...], cn_ref[...]))
    hn_ref[...] = h_f
    cn_ref[...] = c_f


@functools.partial(jax.jit, static_argnames=("hidden_size",))
def lstm_forward(x, w_ih, w_hh, b_ih, b_hh, *, hidden_size):
    """x: (B, T, input_size) float32 (batch_first).

    w_ih: (4H, I), w_hh: (4H, H), b_ih/b_hh: (4H,)  -- PyTorch parameter shapes.
    Returns (output (B,T,H), (h_n (1,B,H), c_n (1,B,H))).
    """
    B, T, _ = x.shape
    H = hidden_size

    Hp = _round_up(H, 128)              # lane-aligned gate blocks
    BB, TC = _choose_tiles(B, T, Hp)    # VMEM-budgeted tile sizes
    Bp = _round_up(B, BB)               # batch padded to a whole number of tiles
    Tp = _round_up(T, TC)               # time padded to a whole number of chunks

    f32, bf16 = jnp.float32, jnp.bfloat16

    # --- Hoisted input projection: one big MXU-friendly matmul over all steps. ---
    bias = (b_ih + b_hh).astype(f32)                                    # (4H,)
    pre = jnp.einsum("bti,gi->btg", x.astype(bf16), w_ih.astype(bf16),
                     preferred_element_type=f32) + bias                 # (B,T,4H) f32

    # Gate-blocked, padded, time-major layout: (Tp, Bp, 4*Hp); gate g occupies
    # lanes [g*Hp, (g+1)*Hp).  Padding stays exactly zero through the recurrence.
    pre = pre.reshape(B, T, 4, H)
    pre = jnp.transpose(pre, (1, 0, 2, 3))                              # (T,B,4,H)
    pre = jnp.pad(pre, ((0, Tp - T), (0, Bp - B), (0, 0), (0, Hp - H)))
    pre = pre.reshape(Tp, Bp, 4 * Hp).astype(bf16)                      # bf16 stream

    # Recurrent weight in the same gate-blocked layout, bf16 for the MXU.
    whh = jnp.transpose(w_hh.reshape(4, H, H), (2, 0, 1))               # (in, gate, out)
    whh = jnp.pad(whh, ((0, Hp - H), (0, 0), (0, Hp - H)))
    whh = whh.reshape(Hp, 4 * Hp).astype(bf16)

    vmem_limit = min(max(int(_vmem_footprint(BB, TC, Hp) * 1.25), 32 << 20), 56 << 20)

    kernel = functools.partial(_lstm_recurrent_kernel, T=T, TC=TC, Hp=Hp)
    out_tm, h_n, c_n = pl.pallas_call(
        kernel,
        out_shape=(
            jax.ShapeDtypeStruct((Tp, Bp, Hp), f32),    # hidden sequence (time-major)
            jax.ShapeDtypeStruct((Bp, Hp), f32),        # h_n
            jax.ShapeDtypeStruct((Bp, Hp), f32),        # c_n
        ),
        grid_spec=pltpu.PrefetchScalarGridSpec(
            num_scalar_prefetch=0,
            grid=(Bp // BB, Tp // TC),
            in_specs=[
                pl.BlockSpec((TC, BB, 4 * Hp), lambda b, c: (c, b, 0)),
                pl.BlockSpec((Hp, 4 * Hp), lambda b, c: (0, 0)),
            ],
            out_specs=[
                pl.BlockSpec((TC, BB, Hp), lambda b, c: (c, b, 0)),
                pl.BlockSpec((BB, Hp), lambda b, c: (b, 0)),
                pl.BlockSpec((BB, Hp), lambda b, c: (b, 0)),
            ],
        ),
        compiler_params=pltpu.CompilerParams(
            dimension_semantics=("parallel", "arbitrary"),
            vmem_limit_bytes=vmem_limit,
        ),
    )(pre, whh)

    output = jnp.transpose(out_tm[:T, :B, :H], (1, 0, 2))               # (B,T,H)
    return output, (h_n[:B, :H][None, ...], c_n[:B, :H][None, ...])


def _lstm_reference(x, w_ih, w_hh, b_ih, b_hh, hidden_size):
    """Pure-JAX f32 reference matching torch.nn.LSTM(batch_first=True)."""
    B, T, _ = x.shape
    H = hidden_size
    h = jnp.zeros((B, H), jnp.float32)
    c = jnp.zeros((B, H), jnp.float32)
    bias = b_ih + b_hh
    outs = []
    for t in range(T):
        gates = x[:, t, :] @ w_ih.T + h @ w_hh.T + bias
        i_g = jax.nn.sigmoid(gates[:, 0 * H:1 * H])
        f_g = jax.nn.sigmoid(gates[:, 1 * H:2 * H])
        g_g = jnp.tanh(gates[:, 2 * H:3 * H])
        o_g = jax.nn.sigmoid(gates[:, 3 * H:4 * H])
        c = f_g * c + i_g * g_g
        h = o_g * jnp.tanh(c)
        outs.append(h)
    return jnp.stack(outs, axis=1), (h[None], c[None])


if __name__ == "__main__":
    # Small shapes consistent with the module's forward: x is (batch, seq, input_size).
    B, T = 2, 8
    input_size, hidden_size, output_size = 16, 32, 32   # output_size unused in forward

    key = jax.random.PRNGKey(0)
    kx, k1, k2, k3, k4 = jax.random.split(key, 5)

    # PyTorch-style uniform(-1/sqrt(H), 1/sqrt(H)) init.
    bound = 1.0 / (hidden_size ** 0.5)
    w_ih = jax.random.uniform(k1, (4 * hidden_size, input_size), jnp.float32, -bound, bound)
    w_hh = jax.random.uniform(k2, (4 * hidden_size, hidden_size), jnp.float32, -bound, bound)
    b_ih = jax.random.uniform(k3, (4 * hidden_size,), jnp.float32, -bound, bound)
    b_hh = jax.random.uniform(k4, (4 * hidden_size,), jnp.float32, -bound, bound)

    x = jax.random.normal(kx, (B, T, input_size), jnp.float32)

    out, (h_n, c_n) = lstm_forward(x, w_ih, w_hh, b_ih, b_hh, hidden_size=hidden_size)
    jax.block_until_ready((out, h_n, c_n))

    # Correctness check vs pure-JAX f32 reference (loose tol for bf16 matmuls/stream).
    ref_out, (ref_h, ref_c) = _lstm_reference(x, w_ih, w_hh, b_ih, b_hh, hidden_size)
    assert out.shape == (B, T, hidden_size)
    assert h_n.shape == (1, B, hidden_size) and c_n.shape == (1, B, hidden_size)
    assert jnp.allclose(out, ref_out, atol=2e-2, rtol=2e-2)
    assert jnp.allclose(h_n, ref_h, atol=2e-2, rtol=2e-2)
    assert jnp.allclose(c_n, ref_c, atol=2e-2, rtol=2e-2)

    print("KERNEL_OK")
</pallas_src>

<mosaic_0001>
module attributes {stable_mosaic.version = 11 : i64} {
  func.func @_lstm_recurrent_kernel(%arg0: i32, %arg1: i32, %arg2: memref<8x8x512xbf16, #tpu.memory_space<vmem>>, %arg3: memref<128x512xbf16, #tpu.memory_space<vmem>>, %arg4: memref<8x8x128xf32, #tpu.memory_space<vmem>>, %arg5: memref<8x128xf32, #tpu.memory_space<vmem>>, %arg6: memref<8x128xf32, #tpu.memory_space<vmem>>) attributes {dimension_semantics = [#tpu.dimension_semantics<parallel>, #tpu.dimension_semantics<arbitrary>], iteration_bounds = array<i64: 1, 1>, scalar_prefetch = 0 : i64, scratch_operands = 0 : i64, tpu.core_type = #tpu.core_type<tc>, window_params = [{transform_indices = @transform_0, window_bounds = array<i64: 8, 8, 512>}, {pipeline_mode = #tpu.pipeline_mode<synchronous>, transform_indices = @transform_1, window_bounds = array<i64: 128, 512>}, {transform_indices = @transform_2, window_bounds = array<i64: 8, 8, 128>}, {transform_indices = @transform_3, window_bounds = array<i64: 8, 128>}, {transform_indices = @transform_4, window_bounds = array<i64: 8, 128>}]} {
    %c0_i32 = arith.constant 0 : i32
    %0 = arith.cmpi eq, %arg1, %c0_i32 : i32
    %1 = arith.extui %0 : i1 to i32
    %c0_i32_0 = arith.constant 0 : i32
    %2 = arith.cmpi ne, %1, %c0_i32_0 : i32
    scf.if %2 {
      %cst = arith.constant 0.000000e+00 : f32
      %10 = vector.broadcast %cst : f32 to vector<8x128xf32>
      %c0_11 = arith.constant 0 : index
      %c0_12 = arith.constant 0 : index
      %11 = vector.load %arg5[%c0_11, %c0_12] : memref<8x128xf32, #tpu.memory_space<vmem>>, vector<8x128xf32>
      tpu.vector_store %arg5[%c0_11, %c0_12], %10 {strides = array<i32>} : memref<8x128xf32, #tpu.memory_space<vmem>>, vector<8x128xf32>,
      %cst_13 = arith.constant 0.000000e+00 : f32
      %12 = vector.broadcast %cst_13 : f32 to vector<8x128xf32>
      %c0_14 = arith.constant 0 : index
      %c0_15 = arith.constant 0 : index
      %13 = vector.load %arg6[%c0_14, %c0_15] : memref<8x128xf32, #tpu.memory_space<vmem>>, vector<8x128xf32>
      tpu.vector_store %arg6[%c0_14, %c0_15], %12 {strides = array<i32>} : memref<8x128xf32, #tpu.memory_space<vmem>>, vector<8x128xf32>,
    } else {
    }
    %c8_i32 = arith.constant 8 : i32
    %3 = arith.muli %arg1, %c8_i32 : i32
    %c0 = arith.constant 0 : index
    %c0_1 = arith.constant 0 : index
    %4 = vector.load %arg5[%c0, %c0_1] : memref<8x128xf32, #tpu.memory_space<vmem>>, vector<8x128xf32>
    %c0_2 = arith.constant 0 : index
    %c0_3 = arith.constant 0 : index
    %5 = vector.load %arg6[%c0_2, %c0_3] : memref<8x128xf32, #tpu.memory_space<vmem>>, vector<8x128xf32>
    %c0_i32_4 = arith.constant 0 : i32
    %c8_i32_5 = arith.constant 8 : i32
    %6 = arith.addi %c0_i32_4, %c8_i32_5 : i32
    %c1_i32 = arith.constant 1 : i32
    %7:2 = scf.for %arg7 = %c0_i32_4 to %6 step %c1_i32 iter_args(%arg8 = %4, %arg9 = %5) -> (vector<8x128xf32>, vector<8x128xf32>)  : i32 {
      %10 = arith.index_cast %arg7 : i32 to index
      %c0_11 = arith.constant 0 : index
      %c0_12 = arith.constant 0 : index
      %11 = vector.load %arg2[%10, %c0_11, %c0_12] : memref<8x8x512xbf16, #tpu.memory_space<vmem>>, vector<1x8x512xbf16>
      %12 = vector.shape_cast %11 : vector<1x8x512xbf16> to vector<8x512xbf16>
      %13 = arith.extf %12 : vector<8x512xbf16> to vector<8x512xf32>
      %14 = arith.truncf %arg8 : vector<8x128xf32> to vector<8x128xbf16>
      %c0_13 = arith.constant 0 : index
      %c0_14 = arith.constant 0 : index
      %15 = vector.load %arg3[%c0_13, %c0_14] : memref<128x512xbf16, #tpu.memory_space<vmem>>, vector<128x512xbf16>
      %cst = arith.constant dense<0.000000e+00> : vector<8x512xf32>
      %16 = tpu.matmul %14, %15, %cst {dimension_numbers = #tpu.dot_dimension_numbers<[1], [0], [0], [1], [0, 0, 1, 1], [], []>} : vector<8x128xbf16>, vector<128x512xbf16>, vector<8x512xf32> -> vector<8x512xf32>
      %17 = arith.addf %13, %16 : vector<8x512xf32>
      %18 = vector.extract_strided_slice %17 {offsets = [0, 0], sizes = [8, 128], strides = [1, 1]} : vector<8x512xf32> to vector<8x128xf32>
      %19 = arith.negf %18 : vector<8x128xf32>
      %20 = math.exp %19 : vector<8x128xf32>
      %cst_15 = arith.constant 1.000000e+00 : f32
      %21 = vector.broadcast %cst_15 : f32 to vector<8x128xf32>
      %22 = arith.addf %21, %20 : vector<8x128xf32>
      %23 = arith.divf %21, %22 : vector<8x128xf32>
      %24 = vector.extract_strided_slice %17 {offsets = [0, 128], sizes = [8, 128], strides = [1, 1]} : vector<8x512xf32> to vector<8x128xf32>
      %25 = arith.negf %24 : vector<8x128xf32>
      %26 = math.exp %25 : vector<8x128xf32>
      %cst_16 = arith.constant 1.000000e+00 : f32
      %27 = vector.broadcast %cst_16 : f32 to vector<8x128xf32>
      %28 = arith.addf %27, %26 : vector<8x128xf32>
      %29 = arith.divf %27, %28 : vector<8x128xf32>
      %30 = vector.extract_strided_slice %17 {offsets = [0, 256], sizes = [8, 128], strides = [1, 1]} : vector<8x512xf32> to vector<8x128xf32>
      %31 = math.tanh %30 : vector<8x128xf32>
      %32 = vector.extract_strided_slice %17 {offsets = [0, 384], sizes = [8, 128], strides = [1, 1]} : vector<8x512xf32> to vector<8x128xf32>
      %33 = arith.negf %32 : vector<8x128xf32>
      %34 = math.exp %33 : vector<8x128xf32>
      %cst_17 = arith.constant 1.000000e+00 : f32
      %35 = vector.broadcast %cst_17 : f32 to vector<8x128xf32>
      %36 = arith.addf %35, %34 : vector<8x128xf32>
      %37 = arith.divf %35, %36 : vector<8x128xf32>
      %38 = arith.mulf %29, %arg9 : vector<8x128xf32>
      %39 = arith.mulf %23, %31 : vector<8x128xf32>
      %40 = arith.addf %38, %39 : vector<8x128xf32>
      %41 = math.tanh %40 : vector<8x128xf32>
      %42 = arith.mulf %37, %41 : vector<8x128xf32>
      %43 = arith.index_cast %arg7 : i32 to index
      %c0_18 = arith.constant 0 : index
      %c0_19 = arith.constant 0 : index
      %44 = vector.load %arg4[%43, %c0_18, %c0_19] : memref<8x8x128xf32, #tpu.memory_space<vmem>>, vector<1x8x128xf32>
      %45 = vector.shape_cast %44 : vector<1x8x128xf32> to vector<8x128xf32>
      %46 = vector.shape_cast %42 : vector<8x128xf32> to vector<1x8x128xf32>
      tpu.vector_store %arg4[%43, %c0_18, %c0_19], %46 {strides = array<i32>} : memref<8x8x128xf32, #tpu.memory_space<vmem>>, vector<1x8x128xf32>,
      %47 = arith.addi %3, %arg7 : i32
      %c8_i32_20 = arith.constant 8 : i32
      %48 = arith.cmpi slt, %47, %c8_i32_20 : i32
      %49 = arith.select %48, %42, %arg8 : vector<8x128xf32>
      %50 = arith.select %48, %40, %arg9 : vector<8x128xf32>
      scf.yield %49, %50 : vector<8x128xf32>, vector<8x128xf32>
    }
    %c8_i32_6 = arith.constant 8 : i32
    %c0_7 = arith.constant 0 : index
    %c0_8 = arith.constant 0 : index
    %8 = vector.load %arg5[%c0_7, %c0_8] : memref<8x128xf32, #tpu.memory_space<vmem>>, vector<8x128xf32>
    tpu.vector_store %arg5[%c0_7, %c0_8], %7#0 {strides = array<i32>} : memref<8x128xf32, #tpu.memory_space<vmem>>, vector<8x128xf32>,
    %c0_9 = arith.constant 0 : index
    %c0_10 = arith.constant 0 : index
    %9 = vector.load %arg6[%c0_9, %c0_10] : memref<8x128xf32, #tpu.memory_space<vmem>>, vector<8x128xf32>
    tpu.vector_store %arg6[%c0_9, %c0_10], %7#1 {strides = array<i32>} : memref<8x128xf32, #tpu.memory_space<vmem>>, vector<8x128xf32>,
    return
  }
  func.func @transform_0(%arg0: i32, %arg1: i32) -> (i32, i32, i32) {
    %c0_i32 = arith.constant 0 : i32
    %c0_i32_0 = arith.constant 0 : i32
    return %arg1, %arg0, %c0_i32 : i32, i32, i32
  }
  func.func @transform_1(%arg0: i32, %arg1: i32) -> (i32, i32) {
    %c0_i32 = arith.constant 0 : i32
    %c0_i32_0 = arith.constant 0 : i32
    %c0_i32_1 = arith.constant 0 : i32
    return %c0_i32, %c0_i32_0 : i32, i32
  }
  func.func @transform_2(%arg0: i32, %arg1: i32) -> (i32, i32, i32) {
    %c0_i32 = arith.constant 0 : i32
    %c0_i32_0 = arith.constant 0 : i32
    return %arg1, %arg0, %c0_i32 : i32, i32, i32
  }
  func.func @transform_3(%arg0: i32, %arg1: i32) -> (i32, i32) {
    %c0_i32 = arith.constant 0 : i32
    %c0_i32_0 = arith.constant 0 : i32
    return %arg0, %c0_i32 : i32, i32
  }
  func.func @transform_4(%arg0: i32, %arg1: i32) -> (i32, i32) {
    %c0_i32 = arith.constant 0 : i32
    %c0_i32_0 = arith.constant 0 : i32
    return %arg0, %c0_i32 : i32, i32
  }
}

</mosaic_0001>

<bundles_post_ra>
// kernel: lstm_forward.1
= control target key start
LH: loop header
LB: loop body
LE: loop exit
PB: predicated region body
PF: predicated region fallthrough
CT: control target
= control target key end

     0   :  { %v536_v0 = vmov 0.0   ;;  %v569_v1 = vmov 0.0   ;;  %v571_v2 = vmov 0.0   ;;  %s573_s19 = smov 0   ;;  %s707_s0 = inlined_call_operand.vmem [shape: bf16[8,8,512], index: 0, kind: input, shape index: {}]   ;;  %s708_s1 = inlined_call_operand.vmem [shape: bf16[128,512], index: 1, kind: input, shape index: {}]   ;;  %s709_s2 = inlined_call_operand.vmem [shape: f32[8,8,128], index: 2, kind: output, shape index: {0}]   ;;  %s710_s3 = inlined_call_operand.vmem [shape: f32[8,128], index: 3, kind: output, shape index: {1}]   ;;  %s711_s4 = inlined_call_operand.vmem [shape: f32[8,128], index: 4, kind: output, shape index: {2}]  }
   0x1   :  { %19 = vst [vmem:[%s710_s3] sm:$0xff] %v536_v0  ;;  %20 = vst [vmem:[%s711_s4] sm:$0xff] %v536_v0 }
   0x2 LB: > { %v448_v3 = vld [vmem:[%s708_s1 + $0x4] ss:$16 sps:$4 sm:$0xff]   ;;  %v450_v4 = vld [vmem:[%s708_s1] ss:$16 sps:$4 sm:$0xff]   ;;  %v537_v5 = vmov 0   ;;  %v41_v35 = vpack.c.bf16 %v530_v2, %v530_v2  ;;  %s421_s8 = sshll.u32 %s534_s19, 4  ;;  %s534_s19 = sphi %s573_s19, %s29_s19   ;;  %v530_v2 = vphi %v571_v2, %v713_v2   ;;  %v526_v1 = vphi %v569_v1, %v712_v1  }
   0x3   : > { %266 = vmatprep.mubr.bf16.mxu0 %v537_v5  ;;  %307 = vmatprep.mubr.bf16.mxu1 %v537_v5  ;;  %v451_v6 = vld [vmem:[%s708_s1 + $0x24] ss:$16 sps:$4 sm:$0xff]   ;;  %v453_v7 = vld [vmem:[%s708_s1 + $0x20] ss:$16 sps:$4 sm:$0xff]   ;;  %v459_v9 = vld [vmem:[%s708_s1 + $0xc] ss:$16 sps:$4 sm:$0xff]   ;;  %s34_s11 = scalar_lea.vmem %s707_s0, %s421_s8 }
   0x4   : > { %234 = vmatprep.subr.bf16.mxu0 %v448_v3  ;;  %v454_v8 = vld [vmem:[%s708_s1 + $0x44] ss:$16 sps:$4 sm:$0xff]   ;;  %v462_v10 = vld [vmem:[%s708_s1 + $0x8] ss:$16 sps:$4 sm:$0xff]   ;;  %v456_v11 = vld [vmem:[%s708_s1 + $0x40] ss:$16 sps:$4 sm:$0xff]   ;;  %275 = vmatprep.subr.bf16.mxu1 %v459_v9 }
   0x5   : > { %235 = vmatpush1.bf16.msra.mxu0 %v450_v4  ;;  %v457_v12 = vld [vmem:[%s708_s1 + $0x64] ss:$16 sps:$4 sm:$0xff]   ;;  %276 = vmatpush1.bf16.msra.mxu1 %v462_v10  ;;  %v465_v13 = vld [vmem:[%s708_s1 + $0x2c] ss:$16 sps:$4 sm:$0xff]   ;;  %v468_v14 = vld [vmem:[%s708_s1 + $0x28] ss:$16 sps:$4 sm:$0xff]  }
   0x6   : > { %236 = vmatprep.subr.bf16.mxu0 %v451_v6  ;;  %277 = vmatprep.subr.bf16.mxu1 %v465_v13  ;;  %v461_v15 = vld [vmem:[%s708_s1 + $0x60] ss:$16 sps:$4 sm:$0xff]   ;;  %v463_v16 = vld [vmem:[%s708_s1 + $0x84] ss:$16 sps:$4 sm:$0xff]   ;;  %v471_v17 = vld [vmem:[%s708_s1 + $0x4c] ss:$16 sps:$4 sm:$0xff]  }
   0x7   : > { %v474_v18 = vld [vmem:[%s708_s1 + $0x48] ss:$16 sps:$4 sm:$0xff]   ;;  %v477_v19 = vld [vmem:[%s708_s1 + $0x6c] ss:$16 sps:$4 sm:$0xff]   ;;  %v467_v20 = vld [vmem:[%s708_s1 + $0x80] ss:$16 sps:$4 sm:$0xff]  }
   0x8   : > { %v469_v21 = vld [vmem:[%s708_s1 + $0xa4] ss:$16 sps:$4 sm:$0xff]   ;;  %v480_v22 = vld [vmem:[%s708_s1 + $0x68] ss:$16 sps:$4 sm:$0xff]   ;;  %v483_v23 = vld [vmem:[%s708_s1 + $0x8c] ss:$16 sps:$4 sm:$0xff]  }
   0x9   : > { %237 = vmatpush1.bf16.msra.mxu0 %v453_v7  ;;  %278 = vmatpush1.bf16.msra.mxu1 %v468_v14  ;;  %v473_v24 = vld [vmem:[%s708_s1 + $0xa0] ss:$16 sps:$4 sm:$0xff]   ;;  %v475_v25 = vld [vmem:[%s708_s1 + $0xc4] ss:$16 sps:$4 sm:$0xff]   ;;  %v486_v26 = vld [vmem:[%s708_s1 + $0x88] ss:$16 sps:$4 sm:$0xff]  }
   0xa   : > { %238 = vmatprep.subr.bf16.mxu0 %v454_v8  ;;  %279 = vmatprep.subr.bf16.mxu1 %v471_v17  ;;  %v487_v27 = vld [vmem:[%s708_s1 + $0xac] ss:$16 sps:$4 sm:$0xff]   ;;  %v479_v28 = vld [vmem:[%s708_s1 + $0xc0] ss:$16 sps:$4 sm:$0xff]   ;;  %v481_v29 = vld [vmem:[%s708_s1 + $0xe4] ss:$16 sps:$4 sm:$0xff]  }
   0xb   : > { %v489_v30 = vld [vmem:[%s708_s1 + $0xa8] ss:$16 sps:$4 sm:$0xff]   ;;  %v490_v31 = vld [vmem:[%s708_s1 + $0xcc] ss:$16 sps:$4 sm:$0xff]   ;;  %v485_v32 = vld [vmem:[%s708_s1 + $0xe0] ss:$16 sps:$4 sm:$0xff]  }
   0xc   : > { %v492_v33 = vld [vmem:[%s708_s1 + $0xc8] ss:$16 sps:$4 sm:$0xff]   ;;  %v493_v34 = vld [vmem:[%s708_s1 + $0xec] ss:$16 sps:$4 sm:$0xff]   ;;  %v35_v37 = vld [vmem:[%s34_s11] sm:$0xff]  ;;  %p348_p0 = scmp.lt.s32.totalorder %s534_s19, 8 }
   0xd   : > { %239 = vmatpush1.bf16.msra.mxu0 %v456_v11  ;;  %280 = vmatpush1.bf16.msra.mxu1 %v474_v18  ;;  %v495_v36 = vld [vmem:[%s708_s1 + $0xe8] ss:$16 sps:$4 sm:$0xff]   ;;  %v37_v38 = vunpack.c.l.bf16 %v35_v37  ;;  %v38_v39 = vunpack.c.h.bf16 %v35_v37  ;;  %s420_s13 = sshll.u32 %s534_s19, 3  ;;  %s29_s19 = sadd.s32 1, %s534_s19  }
   0xe   : > { %240 = vmatprep.subr.bf16.mxu0 %v457_v12  ;;  %281 = vmatprep.subr.bf16.mxu1 %v477_v19  ;;  %v36_v41 = vld [vmem:[%s34_s11 + $0x8] sm:$0xff]  ;;  %s349_s12 = scalar_select %p348_p0, 1, 0 }
   0xf   : > { %v40_v48 = vunpack.c.h.bf16 %v36_v41  ;;  %v39_v54 = vunpack.c.l.bf16 %v36_v41  ;;  %s345_s16 = scalar_lea.vmem %s709_s2, %s420_s13  ;;  %p26_p1 = scmp.ge.s32.totalorder %s29_s19, 8  }
  0x10   : > { %v350_v3 = vstv %s349_s12 }
  0x11   : > { %241 = vmatpush1.bf16.msra.mxu0 %v461_v15  ;;  %282 = vmatpush1.bf16.msra.mxu1 %v480_v22  ;;  %vm351_vm0 = vcmp.eq.s32.totalorder %v350_v3, 1 }
  0x12   : > { %242 = vmatprep.subr.bf16.mxu0 %v463_v16  ;;  %283 = vmatprep.subr.bf16.mxu1 %v483_v23 }
  0x15   : > { %243 = vmatpush1.bf16.msra.mxu0 %v467_v20  ;;  %284 = vmatpush1.bf16.msra.mxu1 %v486_v26 }
  0x16   : > { %244 = vmatprep.subr.bf16.mxu0 %v469_v21  ;;  %285 = vmatprep.subr.bf16.mxu1 %v487_v27 }
  0x19   : > { %245 = vmatpush1.bf16.msra.mxu0 %v473_v24  ;;  %286 = vmatpush1.bf16.msra.mxu1 %v489_v30 }
  0x1a   : > { %246 = vmatprep.subr.bf16.mxu0 %v475_v25  ;;  %287 = vmatprep.subr.bf16.mxu1 %v490_v31 }
  0x1d   : > { %247 = vmatpush1.bf16.msra.mxu0 %v479_v28  ;;  %288 = vmatpush1.bf16.msra.mxu1 %v492_v33 }
  0x1e   : > { %248 = vmatprep.subr.bf16.mxu0 %v481_v29  ;;  %289 = vmatprep.subr.bf16.mxu1 %v493_v34 }
  0x21   : > { %249 = vmatpush1.bf16.msra.mxu0 %v485_v32  ;;  %290 = vmatpush1.bf16.msra.mxu1 %v495_v36 }
  0x24   : > { %267 = vmatmul.mubr.bf16.vlgmr.msra.gmra.mrb[0].mxu0 %v41_v35  ;;  %308 = vmatmul.mubr.bf16.vlgmr.msra.gmra.mrb[0].mxu1 %v41_v35 }
  0xf7   : > { %v268_v40 = vpop.f32.mrb[0].mxu0  ;;  %v309_v50 = vpop.f32.mrb[0].mxu1 }
  0xf8   : > { %v316_v42 = vadd.f32 %v268_v40, %v37_v38  ;;  %v270_v43 = vpop.f32.mrb[1].mxu0  ;;  %v311_v51 = vpop.f32.mrb[1].mxu1  ;;  %v318_v57 = vadd.f32 %v309_v50, %v39_v54 }
  0xf9   : > { %v317_v44 = vadd.f32 %v270_v43, %v38_v39  ;;  %v272_v45 = vpop.f32.mrb[2].mxu0  ;;  %v319_v52 = vadd.f32 %v311_v51, %v40_v48  ;;  %v313_v53 = vpop.f32.mrb[2].mxu1 }
  0xfa   : > { %v417_v46 = vmul.f32 -1.442695, %v316_v42  ;;  %v273_v47 = vpop.f32.mrb[3].mxu0  ;;  %v314_v55 = vpop.f32.mrb[3].mxu1 }
  0xfb   : > { %v418_v49 = vmul.f32 -1.442695, %v317_v44  ;;  %v419_v56 = vmul.f32 -1.442695, %v319_v52 }
  0xfc   : > { %496 = vpow2.f32 %v417_v46 }
  0xfd   : > { %498 = vpow2.f32 %v418_v49 }
  0xfe   : > { %500 = vpow2.f32 %v419_v56 }
  0xff   : > { %502 = vtanh.f32 %v318_v57 }
 0x106   : > { %v497_v58 = vpop.eup %496 }
 0x107   : > { %v499_v59 = vpop.eup %498  ;;  %v323_v60 = vadd.f32 1.0, %v497_v58 }
 0x108   : > { %v329_v61 = vadd.f32 1.0, %v499_v59  ;;  %v501_v62 = vpop.eup %500 }
 0x109   : > { %504 = vrcp.f32 %v323_v60  ;;  %v503_v63 = vpop.eup %502  ;;  %v336_v4 = vadd.f32 1.0, %v501_v62 }
 0x10a   : > { %506 = vrcp.f32 %v329_v61 }
 0x10b   : > { %508 = vrcp.f32 %v336_v4 }
 0x113   : > { %v505_v0 = vpop.eup %504 }
 0x114   : > { %v507_v5 = vpop.eup %506  ;;  %v340_v6 = vmul.f32 %v505_v0, %v503_v63 }
 0x115   : > { %v339_v7 = vmul.f32 %v526_v1, %v507_v5  ;;  %v509_v10 = vpop.eup %508 }
 0x117   : > { %v341_v8 = vadd.f32 %v340_v6, %v339_v7 }
 0x119   : > { %510 = vtanh.f32 %v341_v8  ;;  %v353_v9 = vsel %vm351_vm0, %v341_v8, %v526_v1  }
 0x11a   : > { %v712_v1 = vmov %v353_v9  ;;  %355 = vst [vmem:[%s711_s4] sm:$0xff] (%p26_p1), %v353_v9 }
 0x121   :  { %28 = sbr.rel (!%p26_p1) target bundleno = 2 (0x2), region = 57 }
 0x123   : > { %v511_v11 = vpop.eup %510 }
 0x124   : > { %v343_v12 = vmul.f32 %v511_v11, %v509_v10 }
 0x126   : > { %346 = vst [vmem:[%s345_s16] sm:$0xff] %v343_v12  ;;  %v352_v13 = vsel %vm351_vm0, %v343_v12, %v530_v2  }
 0x127   : > { %v713_v2 = vmov %v352_v13  ;;  %354 = vst [vmem:[%s710_s3] sm:$0xff] (%p26_p1), %v352_v13 }

</bundles_post_ra>
